<compile_context>
chip_gen: v7x
topology: tpu7x:2x2x1
jax: 0.10.0
libtpu: 0.0.40
codegen_flags: <defaults>
</compile_context>

<pallas_src>
import numpy as np
import jax
import jax.numpy as jnp
from jax.experimental import pallas as pl
from jax.experimental.pallas import tpu as pltpu

INF = 1e12  # word.INFINITY_NUMBER
HI = jax.lax.Precision.HIGHEST


# ----------------------------------------------------------------------------
# Pallas kernel: one batch tile (Bt elements) per grid step.
# ----------------------------------------------------------------------------
def plain_gat_kernel(x_ref, mask_ref, adj_ref, wf_ref, bf_ref, hmask_ref,
                     fbias_ref, out_ref, attn_ref):
    Bt, L, D = x_ref.shape
    H = adj_ref.shape[1]

    x2 = x_ref[...].reshape(Bt * L, D)                         # (Bt*L, D)

    # Fused projection: columns = [ value (D) | e_src (H) | e_tgt (H) ].
    proj = jnp.dot(x2, wf_ref[...], precision=HI,
                   preferred_element_type=jnp.float32) + bf_ref[...]
    value = proj[:, :D]                                        # (Bt*L, D)
    e_src = proj[:, D:D + H]                                   # (Bt*L, H)
    e_tgt = proj[:, D + H:D + 2 * H]                           # (Bt*L, H)

    # (Bt*L, H) -> (Bt, H, L)  (tiny tensors; single minor transpose each)
    e_src_t = e_src.reshape(Bt, L, H).transpose(0, 2, 1)
    e_tgt_t = e_tgt.reshape(Bt, L, H).transpose(0, 2, 1)

    # scores[b, h, i, j] = e_tgt[b, h, i] + e_src[b, h, j]; LeakyReLU(0.2)
    scores = e_tgt_t[:, :, :, None] + e_src_t[:, :, None, :]   # (Bt, H, L, L)
    scores = jnp.where(scores > 0, scores, 0.2 * scores)

    adj = adj_ref[...]                                         # (Bt, H, L, L)
    invalid = jnp.logical_or(mask_ref[...][:, None, :, :] > 0.5, adj <= 0.0)
    scores = jnp.where(invalid, -INF, scores)

    # numerically-stable softmax over keys
    m = jnp.max(scores, axis=-1, keepdims=True)
    p = jnp.exp(scores - m)
    attn = p * pl.reciprocal(jnp.sum(p, axis=-1, keepdims=True))

    # normalized branch: attn *= 1/adj, then L1-renormalize.  The final
    # masked/no-edge zero-out is folded into inv_adj (identical result: invalid
    # entries are exactly 0 after softmax except in fully-invalid rows, which end
    # up all-zero either way).
    inv_adj = jnp.where(invalid, 0.0, pl.reciprocal(adj))
    attn = attn * inv_adj
    attn = attn * pl.reciprocal(
        jnp.maximum(jnp.sum(attn, axis=-1, keepdims=True), 1e-12))

    # Head aggregation with a single batched contraction (no per-head lane
    # slices / concat): compute attn_h @ value with the FULL value matrix for
    # every head, then keep each head's own dv-column block via a constant
    # 0/1 head mask and reduce over heads.
    value3 = value.reshape(Bt, L, D)                           # (Bt, L, D)
    attn_flat = attn.reshape(Bt, H * L, L)                     # (Bt, H*L, L)
    out_flat = jnp.einsum('bkj,bjd->bkd', attn_flat, value3, precision=HI,
                          preferred_element_type=jnp.float32)  # (Bt, H*L, D)
    out2 = jnp.sum(out_flat.reshape(Bt, H, L, D) *
                   hmask_ref[...][None, :, None, :], axis=1)   # (Bt, L, D)

    # residual + final bias + ReLU
    final = out2.reshape(Bt * L, D) + x2 + fbias_ref[...]
    final = jnp.maximum(final, 0.0)

    out_ref[...] = final.reshape(Bt, L, D).astype(out_ref.dtype)
    attn_ref[...] = attn.astype(attn_ref.dtype)


# ----------------------------------------------------------------------------
# Wrapper
# ----------------------------------------------------------------------------
def plain_gat_pallas(x, mask, adj, W_v, b_v, w_src, w_tgt, final_bias,
                     max_batch_tile=8):
    B, L, D = x.shape
    H, dv = w_src.shape
    assert H * dv == D

    # --- fold the three projections into one weight / bias (wrapper glue) ---
    Wv3 = W_v.reshape(D, H, dv)
    col_src = jnp.einsum('khd,hd->kh', Wv3, w_src, precision=HI)   # (D, H)
    col_tgt = jnp.einsum('khd,hd->kh', Wv3, w_tgt, precision=HI)   # (D, H)
    W_fused = jnp.concatenate([W_v, col_src, col_tgt], axis=1)     # (D, D+2H)
    b_src = jnp.sum(b_v.reshape(H, dv) * w_src, axis=-1)           # (H,)
    b_tgt = jnp.sum(b_v.reshape(H, dv) * w_tgt, axis=-1)           # (H,)
    b_fused = jnp.concatenate([b_v, b_src, b_tgt]).reshape(1, D + 2 * H)

    # head_mask[h, d] = 1.0 if output column d belongs to head h
    head_mask = (jnp.arange(D)[None, :] // dv ==
                 jnp.arange(H)[:, None]).astype(jnp.float32)       # (H, D)
    fb2 = final_bias.reshape(1, D)

    # Batch tile: largest divisor of B up to max_batch_tile. Amortizes per-step
    # overhead; the remaining grid axis stays "parallel" for multi-TC chips.
    Bt = min(B, max_batch_tile)
    while B % Bt:
        Bt -= 1

    out_shape = (jax.ShapeDtypeStruct((B, L, D), jnp.float32),
                 jax.ShapeDtypeStruct((B, H, L, L), jnp.float32))

    final, attn = pl.pallas_call(
        plain_gat_kernel,
        grid=(B // Bt,),
        in_specs=[
            pl.BlockSpec((Bt, L, D), lambda b: (b, 0, 0)),          # x
            pl.BlockSpec((Bt, L, L), lambda b: (b, 0, 0)),          # mask
            pl.BlockSpec((Bt, H, L, L), lambda b: (b, 0, 0, 0)),    # adj_mask
            pl.BlockSpec((D, D + 2 * H), lambda b: (0, 0)),         # fused weight
            pl.BlockSpec((1, D + 2 * H), lambda b: (0, 0)),         # fused bias
            pl.BlockSpec((H, D), lambda b: (0, 0)),                 # head mask
            pl.BlockSpec((1, D), lambda b: (0, 0)),                 # final bias
        ],
        out_specs=(
            pl.BlockSpec((Bt, L, D), lambda b: (b, 0, 0)),
            pl.BlockSpec((Bt, H, L, L), lambda b: (b, 0, 0, 0)),
        ),
        out_shape=out_shape,
        compiler_params=pltpu.CompilerParams(
            dimension_semantics=("parallel",)),
    )(x, mask, adj, W_fused, b_fused, head_mask, fb2)

    # attn_value_per_head: list of (B, L, L), one per head (torch chunk + squeeze)
    attn_per_head = [attn[:, h] for h in range(H)]
    return final, attn_per_head, attn


# ----------------------------------------------------------------------------
# Pure-JAX reference (mirrors the PyTorch forward exactly)
# ----------------------------------------------------------------------------
def plain_gat_reference(x, mask, adj, W_v, b_v, w_src, w_tgt, final_bias):
    B, L, D = x.shape
    H, dv = w_src.shape
    value2d = jnp.einsum('bld,dk->blk', x, W_v, precision=HI) + b_v[None, None, :]
    value = value2d.reshape(B, L, H, dv).transpose(0, 2, 1, 3)          # (B,H,L,dv)
    e_src = jnp.einsum('bhld,hd->bhl', value, w_src, precision=HI)
    e_tgt = jnp.einsum('bhld,hd->bhl', value, w_tgt, precision=HI)
    scores = e_tgt[:, :, :, None] + e_src[:, :, None, :]                # (B,H,L,L)
    scores = jnp.where(scores > 0, scores, 0.2 * scores)
    masked = mask[:, None, :, :] > 0.5
    no_edge = adj <= 0.0
    scores = jnp.where(masked, -INF, scores)
    scores = jnp.where(no_edge, -INF, scores)
    m = jnp.max(scores, -1, keepdims=True)
    p = jnp.exp(scores - m)
    attn = p / jnp.sum(p, -1, keepdims=True)
    inv_adj = jnp.where(no_edge, 1.0 / INF, 1.0 / jnp.where(no_edge, 1.0, adj))
    attn = attn * inv_adj
    attn = attn / jnp.maximum(jnp.sum(jnp.abs(attn), -1, keepdims=True), 1e-12)
    attn = jnp.where(masked, 0.0, attn)
    attn = jnp.where(no_edge, 0.0, attn)
    out = jnp.einsum('bhij,bhjd->bhid', attn, value, precision=HI)      # (B,H,L,dv)
    out = out.transpose(0, 2, 1, 3).reshape(B, L, D)
    final = out + x + final_bias[None, None, :]
    final = jnp.maximum(final, 0.0)
    return final, attn


# ----------------------------------------------------------------------------
# Main
# ----------------------------------------------------------------------------
if __name__ == "__main__":
    B, L, D, H = 2, 8, 32, 4
    dv = D // H

    key = jax.random.PRNGKey(0)
    k = jax.random.split(key, 8)

    def xavier(key, shape, fan_in, fan_out):
        lim = float(np.sqrt(6.0 / (fan_in + fan_out)))
        return jax.random.uniform(key, shape, jnp.float32, -lim, lim)

    x = jax.random.normal(k[0], (B, L, D), jnp.float32)

    # padding mask: batch 1 masks the last key position
    mask = jnp.zeros((B, L, L), jnp.float32).at[1, :, L - 1].set(1.0)

    # adjacency mask: random edges with positive weights, self-loops + column 0 forced
    edges = (jax.random.uniform(k[1], (B, H, L, L)) < 0.6).astype(jnp.float32)
    edges = edges.at[:, :, jnp.arange(L), jnp.arange(L)].set(1.0)
    edges = edges.at[:, :, :, 0].set(1.0)
    adj = edges * (1.0 + 2.0 * jax.random.uniform(k[2], (B, H, L, L), jnp.float32))

    # parameters (deterministic synthetic init)
    W_v = xavier(k[3], (D, H * dv), D, H * dv)          # value linear weight
    b_v = jax.random.normal(k[4], (H * dv,), jnp.float32) * 0.02
    w_src = xavier(k[5], (H, dv), 1, H * dv)            # weight_vector_value_src
    w_tgt = xavier(k[6], (H, dv), 1, H * dv)            # weight_vector_value_tgt
    final_bias = jnp.zeros((D,), jnp.float32)           # zeros_ init

    final, attn_per_head, attn_full = plain_gat_pallas(
        x, mask, adj, W_v, b_v, w_src, w_tgt, final_bias)
    jax.block_until_ready(final)
    jax.block_until_ready(attn_full)

    ref_final, ref_attn = plain_gat_reference(
        x, mask, adj, W_v, b_v, w_src, w_tgt, final_bias)

    np.testing.assert_allclose(np.asarray(final), np.asarray(ref_final),
                               rtol=2e-5, atol=2e-5)
    np.testing.assert_allclose(np.asarray(attn_full), np.asarray(ref_attn),
                               rtol=2e-5, atol=2e-5)
    assert len(attn_per_head) == H and attn_per_head[0].shape == (B, L, L)

    print("KERNEL_OK")
</pallas_src>

<mosaic_0001>
module attributes {stable_mosaic.version = 11 : i64} {
  func.func @plain_gat_kernel(%arg0: i32, %arg1: memref<2x8x32xf32, #tpu.memory_space<vmem>>, %arg2: memref<2x8x8xf32, #tpu.memory_space<vmem>>, %arg3: memref<2x4x8x8xf32, #tpu.memory_space<vmem>>, %arg4: memref<32x40xf32, #tpu.memory_space<vmem>>, %arg5: memref<1x40xf32, #tpu.memory_space<vmem>>, %arg6: memref<4x32xf32, #tpu.memory_space<vmem>>, %arg7: memref<1x32xf32, #tpu.memory_space<vmem>>, %arg8: memref<2x8x32xf32, #tpu.memory_space<vmem>>, %arg9: memref<2x4x8x8xf32, #tpu.memory_space<vmem>>) attributes {dimension_semantics = [#tpu.dimension_semantics<parallel>], iteration_bounds = array<i64: 1>, scalar_prefetch = 0 : i64, scratch_operands = 0 : i64, tpu.core_type = #tpu.core_type<tc>, window_params = [{transform_indices = @transform_0, window_bounds = array<i64: 2, 8, 32>}, {transform_indices = @transform_1, window_bounds = array<i64: 2, 8, 8>}, {transform_indices = @transform_2, window_bounds = array<i64: 2, 4, 8, 8>}, {pipeline_mode = #tpu.pipeline_mode<synchronous>, transform_indices = @transform_3, window_bounds = array<i64: 32, 40>}, {pipeline_mode = #tpu.pipeline_mode<synchronous>, transform_indices = @transform_4, window_bounds = array<i64: 1, 40>}, {pipeline_mode = #tpu.pipeline_mode<synchronous>, transform_indices = @transform_5, window_bounds = array<i64: 4, 32>}, {pipeline_mode = #tpu.pipeline_mode<synchronous>, transform_indices = @transform_6, window_bounds = array<i64: 1, 32>}, {transform_indices = @transform_7, window_bounds = array<i64: 2, 8, 32>}, {transform_indices = @transform_8, window_bounds = array<i64: 2, 4, 8, 8>}]} {
    %c0 = arith.constant 0 : index
    %c0_0 = arith.constant 0 : index
    %c0_1 = arith.constant 0 : index
    %0 = vector.load %arg1[%c0, %c0_0, %c0_1] : memref<2x8x32xf32, #tpu.memory_space<vmem>>, vector<2x8x32xf32>
    %1 = vector.shape_cast %0 : vector<2x8x32xf32> to vector<16x32xf32>
    %c0_2 = arith.constant 0 : index
    %c0_3 = arith.constant 0 : index
    %2 = vector.load %arg4[%c0_2, %c0_3] : memref<32x40xf32, #tpu.memory_space<vmem>>, vector<32x40xf32>
    %cst = arith.constant dense<0.000000e+00> : vector<16x40xf32>
    %3 = tpu.matmul %1, %2, %cst {dimension_numbers = #tpu.dot_dimension_numbers<[1], [0], [0], [1], [0, 0, 1, 1], [], []>, precision = #tpu.contract_precision<fp32>} : vector<16x32xf32>, vector<32x40xf32>, vector<16x40xf32> -> vector<16x40xf32>
    %c0_4 = arith.constant 0 : index
    %c0_5 = arith.constant 0 : index
    %4 = vector.load %arg5[%c0_4, %c0_5] : memref<1x40xf32, #tpu.memory_space<vmem>>, vector<1x40xf32>
    %5 = vector.broadcast %4 : vector<1x40xf32> to vector<16x40xf32>
    %6 = arith.addf %3, %5 : vector<16x40xf32>
    %7 = vector.extract_strided_slice %6 {offsets = [0, 0], sizes = [16, 32], strides = [1, 1]} : vector<16x40xf32> to vector<16x32xf32>
    %8 = vector.extract_strided_slice %6 {offsets = [0, 32], sizes = [16, 4], strides = [1, 1]} : vector<16x40xf32> to vector<16x4xf32>
    %9 = vector.extract_strided_slice %6 {offsets = [0, 36], sizes = [16, 4], strides = [1, 1]} : vector<16x40xf32> to vector<16x4xf32>
    %10 = vector.shape_cast %8 : vector<16x4xf32> to vector<2x8x4xf32>
    %11 = tpu.transpose %10, [0, 2, 1] : vector<2x8x4xf32> -> vector<2x4x8xf32>
    %12 = vector.shape_cast %9 : vector<16x4xf32> to vector<2x8x4xf32>
    %13 = tpu.transpose %12, [0, 2, 1] : vector<2x8x4xf32> -> vector<2x4x8xf32>
    %14 = vector.shape_cast %13 : vector<2x4x8xf32> to vector<2x4x8x1xf32>
    %15 = vector.shape_cast %11 : vector<2x4x8xf32> to vector<2x4x1x8xf32>
    %16 = vector.broadcast %14 : vector<2x4x8x1xf32> to vector<2x4x8x8xf32>
    %17 = vector.broadcast %15 : vector<2x4x1x8xf32> to vector<2x4x8x8xf32>
    %18 = arith.addf %16, %17 : vector<2x4x8x8xf32>
    %cst_6 = arith.constant 0.000000e+00 : f32
    %19 = vector.broadcast %cst_6 : f32 to vector<2x4x8x8xf32>
    %20 = arith.cmpf ogt, %18, %19 : vector<2x4x8x8xf32>
    %cst_7 = arith.constant 2.000000e-01 : f32
    %21 = vector.broadcast %cst_7 : f32 to vector<2x4x8x8xf32>
    %22 = arith.mulf %21, %18 : vector<2x4x8x8xf32>
    %23 = arith.select %20, %18, %22 : vector<2x4x8x8xi1>, vector<2x4x8x8xf32>
    %c0_8 = arith.constant 0 : index
    %c0_9 = arith.constant 0 : index
    %c0_10 = arith.constant 0 : index
    %c0_11 = arith.constant 0 : index
    %24 = vector.load %arg3[%c0_8, %c0_9, %c0_10, %c0_11] : memref<2x4x8x8xf32, #tpu.memory_space<vmem>>, vector<2x4x8x8xf32>
    %c0_12 = arith.constant 0 : index
    %c0_13 = arith.constant 0 : index
    %c0_14 = arith.constant 0 : index
    %25 = vector.load %arg2[%c0_12, %c0_13, %c0_14] : memref<2x8x8xf32, #tpu.memory_space<vmem>>, vector<2x8x8xf32>
    %26 = vector.shape_cast %25 : vector<2x8x8xf32> to vector<2x1x8x8xf32>
    %cst_15 = arith.constant 5.000000e-01 : f32
    %27 = vector.broadcast %cst_15 : f32 to vector<2x1x8x8xf32>
    %28 = arith.cmpf ogt, %26, %27 : vector<2x1x8x8xf32>
    %cst_16 = arith.constant 0.000000e+00 : f32
    %29 = vector.broadcast %cst_16 : f32 to vector<2x4x8x8xf32>
    %30 = arith.cmpf ole, %24, %29 : vector<2x4x8x8xf32>
    %31 = vector.broadcast %28 : vector<2x1x8x8xi1> to vector<2x4x8x8xi1>
    %32 = arith.ori %31, %30 : vector<2x4x8x8xi1>
    %cst_17 = arith.constant -9.99999995E+11 : f32
    %33 = vector.broadcast %cst_17 : f32 to vector<2x4x8x8xf32>
    %34 = arith.select %32, %33, %23 : vector<2x4x8x8xi1>, vector<2x4x8x8xf32>
    %cst_18 = arith.constant dense<0xFF800000> : vector<2x4x8xf32>
    %35 = vector.multi_reduction <maximumf>, %34, %cst_18 [3] : vector<2x4x8x8xf32> to vector<2x4x8xf32>
    %36 = vector.shape_cast %35 : vector<2x4x8xf32> to vector<2x4x8x1xf32>
    %37 = vector.broadcast %36 : vector<2x4x8x1xf32> to vector<2x4x8x8xf32>
    %38 = arith.subf %34, %37 : vector<2x4x8x8xf32>
    %39 = math.exp %38 : vector<2x4x8x8xf32>
    %cst_19 = arith.constant dense<0.000000e+00> : vector<2x4x8xf32>
    %40 = vector.multi_reduction <add>, %39, %cst_19 [3] : vector<2x4x8x8xf32> to vector<2x4x8xf32>
    %41 = vector.shape_cast %40 : vector<2x4x8xf32> to vector<2x4x8x1xf32>
    %42 = tpu.reciprocal %41 : vector<2x4x8x1xf32> -> vector<2x4x8x1xf32>
    %43 = vector.broadcast %42 : vector<2x4x8x1xf32> to vector<2x4x8x8xf32>
    %44 = arith.mulf %39, %43 : vector<2x4x8x8xf32>
    %45 = tpu.reciprocal %24 : vector<2x4x8x8xf32> -> vector<2x4x8x8xf32>
    %cst_20 = arith.constant 0.000000e+00 : f32
    %46 = vector.broadcast %cst_20 : f32 to vector<2x4x8x8xf32>
    %47 = arith.select %32, %46, %45 : vector<2x4x8x8xi1>, vector<2x4x8x8xf32>
    %48 = arith.mulf %44, %47 : vector<2x4x8x8xf32>
    %cst_21 = arith.constant dense<0.000000e+00> : vector<2x4x8xf32>
    %49 = vector.multi_reduction <add>, %48, %cst_21 [3] : vector<2x4x8x8xf32> to vector<2x4x8xf32>
    %50 = vector.shape_cast %49 : vector<2x4x8xf32> to vector<2x4x8x1xf32>
    %cst_22 = arith.constant 9.99999996E-13 : f32
    %51 = vector.broadcast %cst_22 : f32 to vector<2x4x8x1xf32>
    %52 = arith.maximumf %50, %51 : vector<2x4x8x1xf32>
    %53 = tpu.reciprocal %52 : vector<2x4x8x1xf32> -> vector<2x4x8x1xf32>
    %54 = vector.broadcast %53 : vector<2x4x8x1xf32> to vector<2x4x8x8xf32>
    %55 = arith.mulf %48, %54 : vector<2x4x8x8xf32>
    %56 = vector.shape_cast %7 : vector<16x32xf32> to vector<2x8x32xf32>
    %57 = vector.shape_cast %55 : vector<2x4x8x8xf32> to vector<2x32x8xf32>
    "tpu.trace_start"() <{level = 10 : i32, message = "bkj,bjd->bkd"}> : () -> ()
    %cst_23 = arith.constant dense<0.000000e+00> : vector<2x32x32xf32>
    %58 = tpu.matmul %57, %56, %cst_23 {dimension_numbers = #tpu.dot_dimension_numbers<[2], [1], [1], [2], [0, 0, 0, 1, 1, 2], [0], [0]>, precision = #tpu.contract_precision<fp32>} : vector<2x32x8xf32>, vector<2x8x32xf32>, vector<2x32x32xf32> -> vector<2x32x32xf32>
    "tpu.trace_stop"() : () -> ()
    %59 = vector.shape_cast %58 : vector<2x32x32xf32> to vector<2x4x8x32xf32>
    %c0_24 = arith.constant 0 : index
    %c0_25 = arith.constant 0 : index
    %60 = vector.load %arg6[%c0_24, %c0_25] : memref<4x32xf32, #tpu.memory_space<vmem>>, vector<4x32xf32>
    %61 = vector.shape_cast %60 : vector<4x32xf32> to vector<1x4x1x32xf32>
    %62 = vector.broadcast %61 : vector<1x4x1x32xf32> to vector<2x4x8x32xf32>
    %63 = arith.mulf %59, %62 : vector<2x4x8x32xf32>
    %cst_26 = arith.constant dense<0.000000e+00> : vector<2x8x32xf32>
    %64 = vector.multi_reduction <add>, %63, %cst_26 [1] : vector<2x4x8x32xf32> to vector<2x8x32xf32>
    %65 = vector.shape_cast %64 : vector<2x8x32xf32> to vector<16x32xf32>
    %66 = arith.addf %65, %1 : vector<16x32xf32>
    %c0_27 = arith.constant 0 : index
    %c0_28 = arith.constant 0 : index
    %67 = vector.load %arg7[%c0_27, %c0_28] : memref<1x32xf32, #tpu.memory_space<vmem>>, vector<1x32xf32>
    %68 = vector.broadcast %67 : vector<1x32xf32> to vector<16x32xf32>
    %69 = arith.addf %66, %68 : vector<16x32xf32>
    %cst_29 = arith.constant 0.000000e+00 : f32
    %70 = vector.broadcast %cst_29 : f32 to vector<16x32xf32>
    %71 = arith.maximumf %69, %70 : vector<16x32xf32>
    %72 = vector.shape_cast %71 : vector<16x32xf32> to vector<2x8x32xf32>
    %c0_30 = arith.constant 0 : index
    %c0_31 = arith.constant 0 : index
    %c0_32 = arith.constant 0 : index
    %73 = vector.load %arg8[%c0_30, %c0_31, %c0_32] : memref<2x8x32xf32, #tpu.memory_space<vmem>>, vector<2x8x32xf32>
    tpu.vector_store %arg8[%c0_30, %c0_31, %c0_32], %72 {strides = array<i32>} : memref<2x8x32xf32, #tpu.memory_space<vmem>>, vector<2x8x32xf32>,
    %c0_33 = arith.constant 0 : index
    %c0_34 = arith.constant 0 : index
    %c0_35 = arith.constant 0 : index
    %c0_36 = arith.constant 0 : index
    %74 = vector.load %arg9[%c0_33, %c0_34, %c0_35, %c0_36] : memref<2x4x8x8xf32, #tpu.memory_space<vmem>>, vector<2x4x8x8xf32>
    tpu.vector_store %arg9[%c0_33, %c0_34, %c0_35, %c0_36], %55 {strides = array<i32>} : memref<2x4x8x8xf32, #tpu.memory_space<vmem>>, vector<2x4x8x8xf32>,
    return
  }
  func.func @transform_0(%arg0: i32) -> (i32, i32, i32) {
    %c0_i32 = arith.constant 0 : i32
    %c0_i32_0 = arith.constant 0 : i32
    %c0_i32_1 = arith.constant 0 : i32
    return %arg0, %c0_i32, %c0_i32_0 : i32, i32, i32
  }
  func.func @transform_1(%arg0: i32) -> (i32, i32, i32) {
    %c0_i32 = arith.constant 0 : i32
    %c0_i32_0 = arith.constant 0 : i32
    %c0_i32_1 = arith.constant 0 : i32
    return %arg0, %c0_i32, %c0_i32_0 : i32, i32, i32
  }
  func.func @transform_2(%arg0: i32) -> (i32, i32, i32, i32) {
    %c0_i32 = arith.constant 0 : i32
    %c0_i32_0 = arith.constant 0 : i32
    %c0_i32_1 = arith.constant 0 : i32
    %c0_i32_2 = arith.constant 0 : i32
    return %arg0, %c0_i32, %c0_i32_0, %c0_i32_1 : i32, i32, i32, i32
  }
  func.func @transform_3(%arg0: i32) -> (i32, i32) {
    %c0_i32 = arith.constant 0 : i32
    %c0_i32_0 = arith.constant 0 : i32
    %c0_i32_1 = arith.constant 0 : i32
    return %c0_i32, %c0_i32_0 : i32, i32
  }
  func.func @transform_4(%arg0: i32) -> (i32, i32) {
    %c0_i32 = arith.constant 0 : i32
    %c0_i32_0 = arith.constant 0 : i32
    %c0_i32_1 = arith.constant 0 : i32
    return %c0_i32, %c0_i32_0 : i32, i32
  }
  func.func @transform_5(%arg0: i32) -> (i32, i32) {
    %c0_i32 = arith.constant 0 : i32
    %c0_i32_0 = arith.constant 0 : i32
    %c0_i32_1 = arith.constant 0 : i32
    return %c0_i32, %c0_i32_0 : i32, i32
  }
  func.func @transform_6(%arg0: i32) -> (i32, i32) {
    %c0_i32 = arith.constant 0 : i32
    %c0_i32_0 = arith.constant 0 : i32
    %c0_i32_1 = arith.constant 0 : i32
    return %c0_i32, %c0_i32_0 : i32, i32
  }
  func.func @transform_7(%arg0: i32) -> (i32, i32, i32) {
    %c0_i32 = arith.constant 0 : i32
    %c0_i32_0 = arith.constant 0 : i32
    %c0_i32_1 = arith.constant 0 : i32
    return %arg0, %c0_i32, %c0_i32_0 : i32, i32, i32
  }
  func.func @transform_8(%arg0: i32) -> (i32, i32, i32, i32) {
    %c0_i32 = arith.constant 0 : i32
    %c0_i32_0 = arith.constant 0 : i32
    %c0_i32_1 = arith.constant 0 : i32
    %c0_i32_2 = arith.constant 0 : i32
    return %arg0, %c0_i32, %c0_i32_0, %c0_i32_1 : i32, i32, i32, i32
  }
}

</mosaic_0001>

<bundles_post_ra>
// kernel: tpu_custom_call.1
= control target key start
LH: loop header
LB: loop body
LE: loop exit
PB: predicated region body
PF: predicated region fallthrough
CT: control target
= control target key end

     0   :  { %14 = vsyncpa [#allocation3], 0  ;;  %s3546_s0 = inlined_call_operand.hbm [shape: f32[2,8,32], index: 0, kind: input, shape index: {}]   ;;  %s3547_s1 = inlined_call_operand.hbm [shape: f32[2,8,8], index: 1, kind: input, shape index: {}]   ;;  %s3548_s2 = inlined_call_operand.hbm [shape: f32[2,4,8,8], index: 2, kind: input, shape index: {}]   ;;  %s3549_s3 = inlined_call_operand.hbm [shape: f32[32,40], index: 3, kind: input, shape index: {}]   ;;  %s3550_s4 = inlined_call_operand.vmem [shape: f32[1,40], index: 4, kind: input, shape index: {}]   ;;  %s3551_s5 = inlined_call_operand.vmem [shape: f32[4,32], index: 5, kind: input, shape index: {}]   ;;  %s3552_s6 = inlined_call_operand.vmem [shape: f32[1,32], index: 6, kind: input, shape index: {}]   ;;  %s3553_s7 = inlined_call_operand.hbm [shape: f32[2,8,32], index: 7, kind: output, shape index: {0}]   ;;  %s3554_s8 = inlined_call_operand.hbm [shape: f32[2,4,8,8], index: 8, kind: output, shape index: {1}]  }
   0x1   :  { %15 = vsyncpa [#allocation6], 0 }
   0x2   :  { %16 = vsyncpa [#allocation9], 0 }
   0x3   :  { %17 = vsyncpa [#allocation4], 0 }
   0x4   :  { %18 = vsyncpa [#allocation12], 0  ;;  %s3035_s27 = smov [#allocation5]   ;;  %s3036_s29 = smov [#allocation2]  }
   0x5   :  { %s36_s28 = sshll.u32 %s3035_s27, 4  ;;  %s24_s30 = sshll.u32 %s3036_s29, 4  ;;  %s37_s28 = int_to_ptr.vmem [resolvable:$true] %s36_s28  ;;  %s3091_s30 = int_to_ptr.vmem [resolvable:$true] %s24_s30 }
   0x6   :  { %s2893_s11 = scalar_lea.hbm %s3547_s1, 256 }
   0x7   :  { %p2894_p0 = scmp.ne.s32.totalorder %s3547_s1, %s2893_s11  ;;  %p2897_p1 = scmp.lt.u32.totalorder %s2893_s11, %s3547_s1 }
   0x9   :  { %p2899_p2 = pnand %p2897_p1, %p2894_p0 }
   0xb   :  { %2902 = shalt.err (!%p2899_p2)
}
   0xc   :  { %s2903_s16 = scalar_lea.vmem %s37_s28, 256  ;;  %p2908_p4 = scmp.lt.s32.totalorder %s37_s28, %s37_s28 }
   0xd   :  { %p2904_p3 = scmp.ne.s32.totalorder %s37_s28, %s2903_s16  ;;  %p2909_p5 = scmp.lt.s32.totalorder %s2903_s16, %s2903_s16 }
   0xf   :  { %p2910_p6 = por %p2909_p5, %p2908_p4 }
  0x11   :  { %p2911_p7 = pnand %p2910_p6, %p2904_p3 }
  0x13   :  { %2914 = shalt.err (!%p2911_p7)
}
  0x14   :  { %s3037_s17 = smov 128   ;;  %s3038_s18 = smov 8  }
  0x15   :  { %42 = dma.hbm_to_vmem [thread:$0]  %s3547_s1, 256, %s37_s28, [#allocation6], %s3037_s17, %s3037_s17, %s3038_s18  }
  0x16   :  { %s2915_s23 = scalar_lea.hbm %s3546_s0, 256 }
  0x17   :  { %p2916_p8 = scmp.ne.s32.totalorder %s3546_s0, %s2915_s23  ;;  %p2919_p9 = scmp.lt.u32.totalorder %s2915_s23, %s3546_s0 }
  0x19   :  { %p2921_p10 = pnand %p2919_p9, %p2916_p8 }
  0x1b   :  { %2924 = shalt.err (!%p2921_p10)
}
  0x1c   :  { %s2925_s29 = scalar_lea.vmem %s3091_s30, 256  ;;  %p2930_p12 = scmp.lt.s32.totalorder %s3091_s30, %s3091_s30 }
  0x1d   :  { %p2926_p11 = scmp.ne.s32.totalorder %s3091_s30, %s2925_s29  ;;  %p2931_p13 = scmp.lt.s32.totalorder %s2925_s29, %s2925_s29 }
  0x1f   :  { %p2932_p0 = por %p2931_p13, %p2930_p12 }
  0x21   :  { %p2933_p1 = pnand %p2932_p0, %p2926_p11 }
  0x23   :  { %2936 = shalt.err (!%p2933_p1)
}
  0x24   :  { %30 = dma.hbm_to_vmem [thread:$0]  %s3546_s0, 256, %s3091_s30, [#allocation3], %s3037_s17, %s3037_s17, %s3038_s18  }
  0x25   :  { %s3039_s9 = smov [#allocation7]   ;;  %s3040_s11 = smov [#allocation8]  }
  0x26   :  { %s48_s10 = sshll.u32 %s3039_s9, 4  ;;  %s60_s12 = sshll.u32 %s3040_s11, 4  ;;  %s49_s10 = int_to_ptr.vmem [resolvable:$true] %s48_s10  ;;  %s3128_s12 = int_to_ptr.vmem [resolvable:$true] %s60_s12 }
  0x27   :  { %s2937_s15 = scalar_lea.hbm %s3548_s2, 1024 }
  0x28   :  { %p2938_p2 = scmp.ne.s32.totalorder %s3548_s2, %s2937_s15  ;;  %p2941_p3 = scmp.lt.u32.totalorder %s2937_s15, %s3548_s2 }
  0x2a   :  { %p2943_p4 = pnand %p2941_p3, %p2938_p2 }
  0x2c   :  { %2946 = shalt.err (!%p2943_p4)
}
  0x2d   :  { %s2947_s0 = scalar_lea.vmem %s49_s10, 1024  ;;  %p2952_p6 = scmp.lt.s32.totalorder %s49_s10, %s49_s10 }
  0x2e   :  { %p2948_p5 = scmp.ne.s32.totalorder %s49_s10, %s2947_s0  ;;  %p2953_p7 = scmp.lt.s32.totalorder %s2947_s0, %s2947_s0 }
  0x30   :  { %p2954_p8 = por %p2953_p7, %p2952_p6 }
  0x32   :  { %p2955_p9 = pnand %p2954_p8, %p2948_p5 }
  0x34   :  { %2958 = shalt.err (!%p2955_p9)
}
  0x35   :  { %54 = dma.hbm_to_vmem [thread:$0]  %s3548_s2, 1024, %s49_s10, [#allocation6], %s3037_s17, %s3037_s17, %s3038_s18  }
  0x36   :  { %s2959_s25 = scalar_lea.hbm %s3549_s3, 512 }
  0x37   :  { %p2960_p10 = scmp.ne.s32.totalorder %s3549_s3, %s2959_s25  ;;  %p2963_p11 = scmp.lt.u32.totalorder %s2959_s25, %s3549_s3 }
  0x39   :  { %p2965_p12 = pnand %p2963_p11, %p2960_p10 }
  0x3b   :  { %2968 = shalt.err (!%p2965_p12)
}
  0x3c   :  { %s2969_s28 = scalar_lea.vmem %s3128_s12, 512  ;;  %p2974_p0 = scmp.lt.s32.totalorder %s3128_s12, %s3128_s12 }
  0x3d   :  { %p2970_p13 = scmp.ne.s32.totalorder %s3128_s12, %s2969_s28  ;;  %p2975_p1 = scmp.lt.s32.totalorder %s2969_s28, %s2969_s28 }
  0x3f   :  { %p2976_p2 = por %p2975_p1, %p2974_p0 }
  0x41   :  { %p2977_p3 = pnand %p2976_p2, %p2970_p13 }
  0x43   :  { %2980 = shalt.err (!%p2977_p3)
}
  0x44   :  { %66 = dma.hbm_to_vmem [thread:$0]  %s3549_s3, 512, %s3128_s12, [#allocation9], %s3037_s17, %s3037_s17, %s3038_s18  }
  0x45   :  { %3025 = dma.done.wait [#allocation3], 256  }
  0x46   :  { %3026 = vsyncadd [#allocation3], 4294967040 }
  0x47   :  { %3027 = dma.done.wait [#allocation6], 1280  }
  0x48   :  { %3028 = vsyncadd [#allocation6], 4294966016 }
  0x49   :  { %3029 = dma.done.wait [#allocation9], 512  }
  0x4a   :  { %3030 = vsyncadd [#allocation9], 4294966784  ;;  %vm98_vm0 = vcmask 261120   ;;  %v87_v0 = vld [vmem:[#allocation8] sm:$0xff]  ;;  %v88_v1 = vld [vmem:[#allocation8 + $0x8] sm:$0xff]  ;;  %s3041_s11 = smov 96   ;;  %v775_v58 = vlaneseq }
  0x4b   :  { %v89_v2 = vld [vmem:[#allocation8 + $0x10] sm:$0xff]  ;;  %v106_v3 = vand.u32 4294901760, %v87_v0  ;;  %v109_v4 = vand.u32 4294901760, %v88_v1  ;;  %v90_v5 = vld [vmem:[#allocation8 + $0x18] sm:$0xff]  ;;  %v85_v7 = vld [vmem:[#allocation2] sm:$0xff]  ;;  %s3042_s12 = smov 92  }
  0x4c   :  { %v112_v6 = vand.u32 4294901760, %v89_v2  ;;  %v86_v8 = vld [vmem:[#allocation2 + $0x8] sm:$0xff]  ;;  %v115_v9 = vand.u32 4294901760, %v90_v5  ;;  %v100_v10 = vsel %vm98_vm0, %v85_v7, 0  ;;  %v2454_v46 = vld [vmem:[%s3550_s4] ss:$0 sm:$0xff] }
  0x4d   :  { %v103_v11 = vsel %vm98_vm0, %v86_v8, 0  ;;  %v3167_v12 = vpack.c.bf16 %v109_v4, %v106_v3  ;;  %v3169_v13 = vand.u32 4294901760, %v100_v10  ;;  %v196_v15 = vsub.f32 %v87_v0, %v106_v3  ;;  %s3044_s4 = smov [#allocation11]  }
  0x4e   :  { %v3171_v14 = vand.u32 4294901760, %v103_v11  ;;  %v3173_v16 = vpack.c.bf16 %v115_v9, %v112_v6  ;;  %v203_v17 = vsub.f32 %v88_v1, %v109_v4  ;;  %v210_v18 = vsub.f32 %v89_v2, %v112_v6  ;;  %s2436_s13 = sshll.u32 %s3044_s4, 4  ;;  %s2437_s13 = int_to_ptr.vmem [resolvable:$true] %s2436_s13 }
  0x4f   :  { %v217_v19 = vsub.f32 %v90_v5, %v115_v9  ;;  %2716 = vmatprep.subr.bf16.mxu0 %v3167_v12  ;;  %v175_v20 = vsub.f32 %v100_v10, %v3169_v13  ;;  %v197_v22 = vand.u32 4294901760, %v196_v15  ;;  %v776_v59 = vshrl.u32 %v775_v58, 7  ;;  %s2981_s14 = scalar_lea.vmem %s2437_s13, 1024  ;;  %p2986_p5 = scmp.lt.s32.totalorder %s2437_s13, %s2437_s13 }
  0x50   :  { %v185_v21 = vsub.f32 %v103_v11, %v3171_v14  ;;  %2718 = vmatpush3.bf16.msra.mxu0 %v3167_v12  ;;  %v204_v23 = vand.u32 4294901760, %v203_v17  ;;  %v211_v24 = vand.u32 4294901760, %v210_v18  ;;  %v2731_v42 = vpack.c.bf16 %v203_v17, %v196_v15  ;;  %p2982_p4 = scmp.ne.s32.totalorder %s2437_s13, %s2981_s14  ;;  %p2987_p6 = scmp.lt.s32.totalorder %s2981_s14, %s2981_s14 }
  0x51   :  { %v218_v25 = vand.u32 4294901760, %v217_v19  ;;  %2720 = vmatprep.subr.bf16.mxu0 %v3173_v16  ;;  %v176_v26 = vand.u32 4294901760, %v175_v20  ;;  %v198_v28 = vsub.f32 %v196_v15, %v197_v22  ;;  %v2735_v43 = vpack.c.bf16 %v217_v19, %v210_v18 }
  0x52   :  { %v186_v27 = vand.u32 4294901760, %v185_v21  ;;  %v205_v29 = vsub.f32 %v203_v17, %v204_v23  ;;  %v212_v30 = vsub.f32 %v210_v18, %v211_v24  ;;  %v2747_v44 = vpack.c.bf16 %v204_v23, %v197_v22  ;;  %p2988_p7 = por %p2987_p6, %p2986_p5 }
  0x53   :  { %v219_v31 = vsub.f32 %v217_v19, %v218_v25  ;;  %v177_v32 = vsub.f32 %v175_v20, %v176_v26  ;;  %v199_v34 = vand.u32 4294901760, %v198_v28  ;;  %v2751_v45 = vpack.c.bf16 %v218_v25, %v211_v24 }
  0x54   :  { %v187_v33 = vsub.f32 %v185_v21, %v186_v27  ;;  %2722 = vmatpush3.bf16.msra.mxu0 %v3173_v16  ;;  %v206_v35 = vand.u32 4294901760, %v205_v29  ;;  %v213_v36 = vand.u32 4294901760, %v212_v30  ;;  %v3220_v61 = vsub.s32 0, %v776_v59  ;;  %p2989_p8 = pnand %p2988_p7, %p2982_p4 }
  0x55   :  { %v220_v37 = vand.u32 4294901760, %v219_v31  ;;  %v178_v38 = vand.u32 4294901760, %v177_v32  ;;  %v784_v3 = vsub.s32 1, %v776_v59  ;;  %v791_v5 = vsub.s32 2, %v776_v59  ;;  %v3240_v32 = vld [vmem:[#allocation7 + $0x8] sm:$0xff] }
  0x56   :  { %v188_v39 = vand.u32 4294901760, %v187_v33  ;;  %v2723_v40 = vpack.c.bf16 %v206_v35, %v199_v34  ;;  %v798_v7 = vsub.s32 3, %v776_v59  ;;  %v3043_v15 = vmov 1966171168   ;;  %v3242_v33 = vld [vmem:[#allocation7 + $0x10] sm:$0xff] }
  0x57   :  { %v2727_v41 = vpack.c.bf16 %v220_v37, %v213_v36  ;;  %2561 = vmatprep.mubr.f32.mxu0 %v178_v38  ;;  %vm966_vm3 = vcmp.le.f32.partialorder %v3240_v32, 0.0  ;;  %vm967_vm4 = vcmp.le.f32.partialorder %v3242_v33, 0.0  ;;  %vm993_vm7 = vcmask 64512  }
  0x58   :  { %2562 = vmatmul.mubr.f32.vlgmr.msra.gmra.mrb[0].mxu0 %v188_v39  ;;  %2724 = vmatprep.subr.bf16.mxu0 %v2723_v40 }
  0x59   :  { %2726 = vmatpush3.bf16.msra.mxu0 %v2723_v40  ;;  %2572 = vmatprep.mubr.f32.mxu0 %v3169_v13 }
  0x5a   :  { %2728 = vmatprep.subr.bf16.mxu0 %v2727_v41 }
  0x5d   :  { %2730 = vmatpush3.bf16.msra.mxu0 %v2727_v41 }
  0x5e   :  { %2732 = vmatprep.subr.bf16.mxu0 %v2731_v42 }
  0x60   :  { %2573 = vmatmul.mubr.f32.vlgmr.msra.gmra.mrb[0].mxu0 %v3171_v14 }
  0x61   :  { %2734 = vmatpush3.bf16.msra.mxu0 %v2731_v42  ;;  %2583 = vmatprep.mubr.f32.mxu0 %v175_v20  ;;  %v3255_v42 = vld [vmem:[#allocation7 + $0x18] sm:$0xff] }
  0x62   :  { %2736 = vmatprep.subr.bf16.mxu0 %v2735_v43  ;;  %vm968_vm12 = vcmp.le.f32.partialorder %v3255_v42, 0.0 }
  0x65   :  { %2738 = vmatpush3.bf16.msra.mxu0 %v2735_v43 }
  0x66   :  { %2740 = vmatprep.subr.bf16.mxu0 %v3167_v12 }
  0x68   :  { %2584 = vmatmul.mubr.f32.vlgmr.msra.gmra.mrb[0].mxu0 %v185_v21 }
  0x69   :  { %2742 = vmatpush3.bf16.msra.mxu0 %v3167_v12  ;;  %2594 = vmatprep.mubr.f32.mxu0 %v176_v26  ;;  %v3236_v26 = vld [vmem:[#allocation7] sm:$0xff] }
  0x6a   :  { %2744 = vmatprep.subr.bf16.mxu0 %v3173_v16  ;;  %vm965_vm2 = vcmp.le.f32.partialorder %v3236_v26, 0.0 }
  0x6d   :  { %2746 = vmatpush3.bf16.msra.mxu0 %v3173_v16 }
  0x6e   :  { %2748 = vmatprep.subr.bf16.mxu0 %v2747_v44 }
  0x70   :  { %2595 = vmatmul.mubr.f32.vlgmr.msra.gmra.mrb[0].mxu0 %v186_v27  ;;  %v961_v27 = vld [vmem:[#allocation5] sm:$0xff] }
  0x71   :  { %2750 = vmatpush3.bf16.msra.mxu0 %v2747_v44  ;;  %2605 = vmatprep.mubr.f32.mxu0 %v3169_v13  ;;  %vm963_vm1 = vcmp.gt.f32.partialorder %v961_v27, 0.5 }
  0x72   :  { %2752 = vmatprep.subr.bf16.mxu0 %v2751_v45  ;;  %vm3251_vm6 = vmor %vm963_vm1, %vm965_vm2 }
  0x73   :  { %vm3258_vm9 = vmor %vm963_vm1, %vm966_vm3 }
  0x74   :  { %vm3269_vm11 = vmor %vm963_vm1, %vm967_vm4 }
  0x75   :  { %2754 = vmatpush3.bf16.msra.mxu0 %v2751_v45  ;;  %vm3287_vm14 = vmor %vm963_vm1, %vm968_vm12 }
  0x76   :  { %2756 = vmatprep.subr.bf16.mxu0 %v3167_v12 }
  0x78   :  { %2606 = vmatmul.mubr.f32.vlgmr.msra.gmra.mrb[0].mxu0 %v3171_v14 }
  0x79   :  { %2758 = vmatpush3.bf16.msra.mxu0 %v3167_v12  ;;  %2616 = vmatprep.mubr.f32.mxu0 %v3169_v13 }
  0x7a   :  { %2760 = vmatprep.subr.bf16.mxu0 %v3173_v16 }
  0x7d   :  { %2762 = vmatpush3.bf16.msra.mxu0 %v3173_v16  ;;  %v834_v16 = vunpack.c.l.s4 %v3043_v15 }
  0x7f   :  { %v835_v18 = vunpack.c.0.s8 %v834_v16 }
  0x80   :  { %2617 = vmatmul.mubr.f32.vlgmr.msra.gmra.mrb[0].mxu0 %v3171_v14 }
  0x81   :  { %v3232_v20 = vsub.s32 %v835_v18, %v776_v59 }
 0x153   :  { %v2618_v47 = vpop.f32.mrb[0].mxu0 }
 0x154   :  { %v623_v48 = vpop.f32.mrb[1].mxu0  ;;  %v3200_v51 = vadd.f32 %v2618_v47, %v2454_v46 }
 0x155   :  { %v2764_v49 = vadd.f32 %v2454_v46, %v623_v48 }
 0x157   :  { %v3198_v50 = vand.u32 4294901760, %v2764_v49  ;;  %635 = vrot.lane.b32.xlu1 %v2764_v49, %s3041_s11  ;;  %705 = vrot.lane.b32.xlu0 %v2764_v49, %s3042_s12 }
 0x159   :  { %v3203_v52 = vsub.f32 %v2764_v49, %v3198_v50  ;;  %2619 = vmatprep.subr.mxu0 %v3198_v50  ;;  %2643 = vmatprep.subr.mxu1 %v3198_v50 }
 0x15a   :  { %2620 = vmatpush3.msra.mxu0 %v3198_v50  ;;  %2644 = vmatpush3.msra.mxu1 %v3198_v50 }
 0x15b   :  { %707 = vrot.lane.b32.xlu0 %v3200_v51, %s3042_s12  ;;  %v3211_v53 = vand.u32 4294901760, %v3203_v52 }
 0x15d   :  { %2651 = vmatprep.subr.mxu1 %v3211_v53  ;;  %v1276_v54 = vsub.f32 %v3203_v52, %v3211_v53 }
 0x15f   :  { %637 = vrot.lane.b32.xlu0 %v3200_v51, %s3041_s11  ;;  %v3217_v55 = vand.u32 4294901760, %v1276_v54 }
 0x161   :  { %2627 = vmatprep.subr.mxu0 %v3217_v55 }
 0x1c9   :  { %v706_v56 = vpop.permute.xlu0 %705  ;;  %v636_v60 = vpop.permute.xlu1 %635 }
 0x1ca   :  { %711 = vxpose.xlu1.b32.start.end [1/1] (short) (narrow) %v706_v56, 8 }
 0x1cd   :  { %v708_v57 = vpop.permute.xlu0 %707 }
 0x1ce   :  { %743 = vxpose.xlu0.b32.start.end [1/1] (short) (narrow) %v708_v57, 8 }
 0x1d1   :  { %v638_v62 = vpop.permute.xlu0 %637 }
 0x24a   :  { %v727_v63 = vpop.trf.xlu1 }
 0x24b   :  { %v778_v0 = vrot.slane %v727_v63, %v3220_v61  ;;  %v785_v9 = vrot.slane %v727_v63, %v784_v3  ;;  %v792_v10 = vrot.slane %v727_v63, %v791_v5  ;;  %v799_v11 = vrot.slane %v727_v63, %v798_v7 }
 0x24d   :  { %780 = vbcast.lane.b32.xlu0 %v778_v0, 256 }
 0x24e   :  { %v759_v1 = vpop.trf.xlu0 }
 0x24f   :  { %v806_v2 = vrot.slane %v759_v1, %v3220_v61  ;;  %v813_v4 = vrot.slane %v759_v1, %v784_v3  ;;  %v820_v6 = vrot.slane %v759_v1, %v791_v5  ;;  %v827_v8 = vrot.slane %v759_v1, %v798_v7 }
 0x251   :  { %808 = vbcast.lane.b32.xlu1 %v806_v2, 256 }
 0x255   :  { %815 = vbcast.lane.b32.xlu1 %v813_v4, 256 }
 0x259   :  { %822 = vbcast.lane.b32.xlu1 %v820_v6, 256 }
 0x25d   :  { %829 = vbcast.lane.b32.xlu1 %v827_v8, 256 }
 0x261   :  { %787 = vbcast.lane.b32.xlu1 %v785_v9, 256 }
 0x265   :  { %794 = vbcast.lane.b32.xlu1 %v792_v10, 256  ;;  %v3301_v10 = vld [vmem:[#allocation7 + $0x20] sm:$0xff] }
 0x266   :  { %vm969_vm1 = vcmp.le.f32.partialorder %v3301_v10, 0.0 }
 0x269   :  { %801 = vbcast.lane.b32.xlu1 %v799_v11, 256  ;;  %v962_v11 = vld [vmem:[#allocation5 + $0x8] sm:$0xff] }
 0x26a   :  { %vm964_vm15 = vcmp.gt.f32.partialorder %v962_v11, 0.5 }
 0x26b   :  { %641 = vxpose.xlu0.b32.start.end [1/1] (short) (narrow) %v636_v60, 8  ;;  %vm3314_vm4 = vmor %vm964_vm15, %vm969_vm1 }
 0x292   :  { %673 = vxpose.xlu1.b32.start.end [1/1] (short) (narrow) %v638_v62, 8 }
 0x2bf   :  { %v781_v19 = vpop.permute.xlu0 %780 }
 0x2c3   :  { %v3224_v12 = vpop.permute.xlu1 %808 }
 0x2c7   :  { %v3226_v13 = vpop.permute.xlu1 %815 }
 0x2cb   :  { %v3228_v14 = vpop.permute.xlu1 %822 }
 0x2cf   :  { %v3230_v17 = vpop.permute.xlu1 %829 }
 0x2d3   :  { %v788_v21 = vpop.permute.xlu1 %787 }
 0x2d7   :  { %v795_v28 = vpop.permute.xlu1 %794 }
 0x2db   :  { %v802_v43 = vpop.permute.xlu1 %801 }
 0x2eb   :  { %v657_v22 = vpop.trf.xlu0 }
 0x2ec   :  { %v839_v23 = vrot.slane %v657_v22, %v3232_v20 }
 0x2ee   :  { %v840_v24 = vcombine.high %v839_v23, %v839_v23  ;;  %v847_v25 = vrot.slane %v839_v23, %v3232_v20 }
 0x2f0   :  { %v854_v29 = vrot.slane %v840_v24, %v3232_v20  ;;  %v855_v30 = vcombine.high %v847_v25, %v847_v25  ;;  %v884_v31 = vrot.slane %v847_v25, %v3220_v61 }
 0x2f2   :  { %v856_v34 = vcombine.high %v854_v29, %v854_v29  ;;  %v888_v35 = vrot.slane %v854_v29, %v3220_v61  ;;  %v892_v36 = vrot.slane %v855_v30, %v3220_v61  ;;  %v921_v37 = vadd.f32 %v884_v31, %v781_v19  ;;  %v3305_v19 = vld [vmem:[#allocation7 + $0x28] sm:$0xff]  ;;  %v3319_v30 = vld [vmem:[#allocation7 + $0x30] sm:$0xff] }
 0x2f3   :  { %vm970_vm2 = vcmp.le.f32.partialorder %v3305_v19, 0.0  ;;  %vm971_vm12 = vcmp.le.f32.partialorder %v3319_v30, 0.0 }
 0x2f4   :  { %v896_v38 = vrot.slane %v856_v34, %v3220_v61  ;;  %vm929_vm5 = vcmp.gt.f32.partialorder %v921_v37, 0.0  ;;  %v937_v39 = vmul.f32 0.2, %v921_v37  ;;  %v922_v41 = vadd.f32 %v888_v35, %v788_v21 }
 0x2f5   :  { %v923_v44 = vadd.f32 %v892_v36, %v795_v28 }
 0x2f6   :  { %v945_v45 = vsel %vm929_vm5, %v921_v37, %v937_v39  ;;  %vm930_vm8 = vcmp.gt.f32.partialorder %v922_v41, 0.0  ;;  %v938_v46 = vmul.f32 0.2, %v922_v41  ;;  %v924_v48 = vadd.f32 %v896_v38, %v802_v43  ;;  %v3332_v39 = vld [vmem:[#allocation7 + $0x38] sm:$0xff] }
 0x2f7   :  { %v3264_v49 = vsel %vm3251_vm6, -1e+12, %v945_v45  ;;  %vm931_vm10 = vcmp.gt.f32.partialorder %v923_v44, 0.0  ;;  %v939_v54 = vmul.f32 0.2, %v923_v44 }
 0x2f8   :  { %v994_v57 = vsel %vm993_vm7, %v3264_v49, -inf  ;;  %v946_v58 = vsel %vm930_vm8, %v922_v41, %v938_v46  ;;  %vm932_vm13 = vcmp.gt.f32.partialorder %v924_v48, 0.0  ;;  %v940_v59 = vmul.f32 0.2, %v924_v48  ;;  %vm3323_vm8 = vmor %vm964_vm15, %vm970_vm2 }
 0x2f9   :  { %995 = vmax.xlane.f32.xlu0 %v994_v57  ;;  %v3278_v60 = vsel %vm3258_vm9, -1e+12, %v946_v58  ;;  %v947_v62 = vsel %vm931_vm10, %v923_v44, %v939_v54  ;;  %vm972_vm2 = vcmp.le.f32.partialorder %v3332_v39, 0.0 }
 0x2fa   :  { %v997_v63 = vsel %vm993_vm7, %v3278_v60, -inf  ;;  %v3284_v0 = vsel %vm3269_vm11, -1e+12, %v947_v62  ;;  %v948_v1 = vsel %vm932_vm13, %v924_v48, %v940_v59  ;;  %vm3337_vm13 = vmor %vm964_vm15, %vm971_vm12 }
 0x2fb   :  { %998 = vmax.xlane.f32.xlu1 %v997_v63  ;;  %v1000_v3 = vsel %vm993_vm7, %v3284_v0, -inf  ;;  %v3295_v4 = vsel %vm3287_vm14, -1e+12, %v948_v1 }
 0x2fc   :  { %v1003_v5 = vsel %vm993_vm7, %v3295_v4, -inf }
 0x2fd   :  { %1001 = vmax.xlane.f32.xlu0 %v1000_v3 }
 0x301   :  { %1004 = vmax.xlane.f32.xlu0 %v1003_v5 }
 0x312   :  { %v689_v6 = vpop.trf.xlu1 }
 0x313   :  { %v863_v7 = vrot.slane %v689_v6, %v3232_v20 }
 0x315   :  { %v864_v8 = vcombine.high %v863_v7, %v863_v7  ;;  %v871_v9 = vrot.slane %v863_v7, %v3232_v20 }
 0x317   :  { %v878_v15 = vrot.slane %v864_v8, %v3232_v20  ;;  %v879_v16 = vcombine.high %v871_v9, %v871_v9  ;;  %v900_v18 = vrot.slane %v871_v9, %v3220_v61 }
 0x319   :  { %v880_v21 = vcombine.high %v878_v15, %v878_v15  ;;  %v904_v22 = vrot.slane %v878_v15, %v3220_v61  ;;  %v908_v23 = vrot.slane %v879_v16, %v3220_v61  ;;  %v925_v24 = vadd.f32 %v900_v18, %v3224_v12 }
 0x31b   :  { %v912_v25 = vrot.slane %v880_v21, %v3220_v61  ;;  %vm933_vm3 = vcmp.gt.f32.partialorder %v925_v24, 0.0  ;;  %v941_v27 = vmul.f32 0.2, %v925_v24  ;;  %v926_v29 = vadd.f32 %v904_v22, %v3226_v13 }
 0x31c   :  { %v927_v31 = vadd.f32 %v908_v23, %v3228_v14 }
 0x31d   :  { %v949_v34 = vsel %vm933_vm3, %v925_v24, %v941_v27  ;;  %vm934_vm5 = vcmp.gt.f32.partialorder %v926_v29, 0.0  ;;  %v942_v12 = vmul.f32 0.2, %v926_v29  ;;  %v928_v36 = vadd.f32 %v912_v25, %v3230_v17  ;;  %vm3346_vm3 = vmor %vm964_vm15, %vm972_vm2 }
 0x31e   :  { %v989_v37 = vsel %vm3314_vm4, -1e+12, %v949_v34  ;;  %vm935_vm10 = vcmp.gt.f32.partialorder %v927_v31, 0.0  ;;  %v943_v38 = vmul.f32 0.2, %v927_v31 }
 0x31f   :  { %v1006_v13 = vsel %vm993_vm7, %v989_v37, -inf  ;;  %v950_v14 = vsel %vm934_vm5, %v926_v29, %v942_v12  ;;  %v944_v44 = vmul.f32 0.2, %v928_v36  ;;  %vm936_vm1 = vcmp.gt.f32.partialorder %v928_v36, 0.0 }
 0x320   :  { %1007 = vmax.xlane.f32.xlu0 %v1006_v13  ;;  %v990_v41 = vsel %vm3323_vm8, -1e+12, %v950_v14  ;;  %v951_v43 = vsel %vm935_vm10, %v927_v31, %v943_v38 }
 0x321   :  { %v1009_v45 = vsel %vm993_vm7, %v990_v41, -inf  ;;  %v991_v46 = vsel %vm3337_vm13, -1e+12, %v951_v43  ;;  %v952_v48 = vsel %vm936_vm1, %v928_v36, %v944_v44 }
 0x322   :  { %v1012_v57 = vsel %vm993_vm7, %v991_v46, -inf  ;;  %v992_v58 = vsel %vm3346_vm3, -1e+12, %v952_v48 }
 0x323   :  { %v1015_v59 = vsel %vm993_vm7, %v992_v58, -inf }
 0x324   :  { %1010 = vmax.xlane.f32.xlu0 %v1009_v45 }
 0x328   :  { %1013 = vmax.xlane.f32.xlu0 %v1012_v57 }
 0x32c   :  { %1016 = vmax.xlane.f32.xlu0 %v1015_v59 }
 0x386   :  { %v996_v62 = vpop.xlane.xlu0 %995 }
 0x387   :  { %v1018_v63 = vsub.f32 %v3264_v49, %v996_v62 }
 0x388   :  { %v999_v1 = vpop.xlane.xlu1 %998 }
 0x389   :  { %v1026_v3 = vmul.f32 1.442695, %v1018_v63  ;;  %v1019_v5 = vsub.f32 %v3278_v60, %v999_v1 }
 0x38a   :  { %v1002_v6 = vpop.xlane.xlu0 %1001 }
 0x38b   :  { %2827 = vpow2.f32 %v1026_v3  ;;  %v1028_v7 = vmul.f32 1.442695, %v1019_v5  ;;  %v1020_v8 = vsub.f32 %v3284_v0, %v1002_v6 }
 0x38d   :  { %2829 = vpow2.f32 %v1028_v7  ;;  %v1030_v9 = vmul.f32 1.442695, %v1020_v8 }
 0x38e   :  { %v1005_v11 = vpop.xlane.xlu0 %1004 }
 0x38f   :  { %2831 = vpow2.f32 %v1030_v9  ;;  %v1021_v15 = vsub.f32 %v3295_v4, %v1005_v11 }
 0x391   :  { %v1032_v16 = vmul.f32 1.442695, %v1021_v15 }
 0x393   :  { %2833 = vpow2.f32 %v1032_v16 }
 0x395   :  { %v2828_v18 = vpop.eup %2827 }
 0x396   :  { %v1042_v49 = vsel %vm993_vm7, %v2828_v18, 0.0 }
 0x397   :  { %v2830_v21 = vpop.eup %2829  ;;  %1043 = vadd.xlane.f32.xlu1 %v1042_v49 }
 0x398   :  { %v1045_v60 = vsel %vm993_vm7, %v2830_v21, 0.0 }
 0x399   :  { %v2832_v22 = vpop.eup %2831  ;;  %1046 = vadd.xlane.f32.xlu0 %v1045_v60 }
 0x39a   :  { %v1048_v23 = vsel %vm993_vm7, %v2832_v22, 0.0 }
 0x39b   :  { %1049 = vadd.xlane.f32.xlu1 %v1048_v23 }
 0x39d   :  { %v3361_v0 = vpop.eup %2833 }
 0x39e   :  { %v1051_v24 = vsel %vm993_vm7, %v3361_v0, 0.0 }
 0x39f   :  { %1052 = vadd.xlane.f32.xlu0 %v1051_v24 }
 0x3ad   :  { %v1008_v4 = vpop.xlane.xlu0 %1007 }
 0x3ae   :  { %v1022_v25 = vsub.f32 %v989_v37, %v1008_v4 }
 0x3b0   :  { %v1034_v27 = vmul.f32 1.442695, %v1022_v25 }
 0x3b1   :  { %v1011_v29 = vpop.xlane.xlu0 %1010 }
 0x3b2   :  { %2835 = vpow2.f32 %v1034_v27  ;;  %v1023_v31 = vsub.f32 %v990_v41, %v1011_v29 }
 0x3b4   :  { %v1036_v34 = vmul.f32 1.442695, %v1023_v31 }
 0x3b5   :  { %v1014_v12 = vpop.xlane.xlu0 %1013 }
 0x3b6   :  { %2837 = vpow2.f32 %v1036_v34  ;;  %v1024_v36 = vsub.f32 %v991_v46, %v1014_v12 }
 0x3b8   :  { %v1038_v38 = vmul.f32 1.442695, %v1024_v36 }
 0x3b9   :  { %v1017_v13 = vpop.xlane.xlu0 %1016 }
 0x3ba   :  { %2839 = vpow2.f32 %v1038_v38  ;;  %v1025_v14 = vsub.f32 %v992_v58, %v1017_v13 }
 0x3bc   :  { %v3365_v43 = vpop.eup %2835  ;;  %v1040_v44 = vmul.f32 1.442695, %v1025_v14 }
 0x3bd   :  { %v1054_v45 = vsel %vm993_vm7, %v3365_v43, 0.0 }
 0x3be   :  { %2841 = vpow2.f32 %v1040_v44  ;;  %1055 = vadd.xlane.f32.xlu1 %v1054_v45 }
 0x3bf   :  { %2843 = vrcp.f32 %v3236_v26 }
 0x3c0   :  { %v3369_v37 = vpop.eup %2837  ;;  %2845 = vrcp.f32 %v3240_v32 }
 0x3c1   :  { %v1057_v41 = vsel %vm993_vm7, %v3369_v37, 0.0 }
 0x3c2   :  { %1058 = vadd.xlane.f32.xlu0 %v1057_v41 }
 0x3c4   :  { %v3373_v48 = vpop.eup %2839 }
 0x3c5   :  { %v1060_v46 = vsel %vm993_vm7, %v3373_v48, 0.0 }
 0x3c6   :  { %1061 = vadd.xlane.f32.xlu1 %v1060_v46 }
 0x3c8   :  { %v3377_v57 = vpop.eup %2841 }
 0x3c9   :  { %v1063_v58 = vsel %vm993_vm7, %v3377_v57, 0.0  ;;  %v2844_v1 = vpop.eup %2843 }
 0x3ca   :  { %1064 = vadd.xlane.f32.xlu0 %v1063_v58  ;;  %v2846_v5 = vpop.eup %2845  ;;  %v1090_v26 = vsel %vm3251_vm6, 0.0, %v2844_v1 }
 0x424   :  { %v1044_v59 = vpop.xlane.xlu1 %1043 }
 0x425   :  { %2847 = vrcp.f32 %v1044_v59 }
 0x426   :  { %2849 = vrcp.f32 %v3242_v33  ;;  %v1047_v62 = vpop.xlane.xlu0 %1046  ;;  %v1091_v33 = vsel %vm3258_vm9, 0.0, %v2846_v5 }
 0x427   :  { %2851 = vrcp.f32 %v1047_v62 }
 0x428   :  { %v1050_v63 = vpop.xlane.xlu1 %1049 }
 0x429   :  { %2853 = vrcp.f32 %v1050_v63 }
 0x42a   :  { %2855 = vrcp.f32 %v3255_v42 }
 0x42c   :  { %v1053_v3 = vpop.xlane.xlu0 %1052 }
 0x42d   :  { %2857 = vrcp.f32 %v1053_v3 }
 0x42e   :  { %2859 = vrcp.f32 %v3301_v10 }
 0x42f   :  { %v2848_v6 = vpop.eup %2847 }
 0x430   :  { %v2850_v7 = vpop.eup %2849  ;;  %v1074_v32 = vmul.f32 %v2848_v6, %v2828_v18 }
 0x431   :  { %v2852_v8 = vpop.eup %2851  ;;  %v1092_v42 = vsel %vm3269_vm11, 0.0, %v2850_v7 }
 0x432   :  { %v3389_v9 = vmul.f32 %v1090_v26, %v1074_v32  ;;  %v1075_v11 = vmul.f32 %v2852_v8, %v2830_v21 }
 0x433   :  { %v2854_v15 = vpop.eup %2853 }
 0x434   :  { %v2856_v16 = vpop.eup %2855  ;;  %v1106_v49 = vsel %vm993_vm7, %v3389_v9, 0.0  ;;  %v3395_v60 = vmul.f32 %v1091_v33, %v1075_v11  ;;  %v1076_v40 = vmul.f32 %v2854_v15, %v2832_v22 }
 0x435   :  { %1107 = vadd.xlane.f32.xlu1 %v1106_v49  ;;  %v1093_v21 = vsel %vm3287_vm14, 0.0, %v2856_v16 }
 0x436   :  { %v1109_v18 = vsel %vm993_vm7, %v3395_v60, 0.0  ;;  %v3399_v47 = vmul.f32 %v1092_v42, %v1076_v40 }
 0x437   :  { %v2858_v23 = vpop.eup %2857  ;;  %1110 = vadd.xlane.f32.xlu0 %v1109_v18 }
 0x438   :  { %v1112_v56 = vsel %vm993_vm7, %v3399_v47, 0.0  ;;  %v1077_v24 = vmul.f32 %v2858_v23, %v3361_v0  ;;  %v2860_v27 = vpop.eup %2859 }
 0x439   :  { %1113 = vadd.xlane.f32.xlu1 %v1112_v56  ;;  %v1094_v31 = vsel %vm3314_vm4, 0.0, %v2860_v27 }
 0x43a   :  { %v3406_v4 = vmul.f32 %v1093_v21, %v1077_v24 }
 0x43c   :  { %v1115_v22 = vsel %vm993_vm7, %v3406_v4, 0.0 }
 0x43d   :  { %1116 = vadd.xlane.f32.xlu0 %v1115_v22 }
 0x44b   :  { %v1056_v25 = vpop.xlane.xlu1 %1055 }
 0x44c   :  { %2861 = vrcp.f32 %v1056_v25 }
 0x44d   :  { %2863 = vrcp.f32 %v3305_v19 }
 0x44f   :  { %v1059_v2 = vpop.xlane.xlu0 %1058 }
 0x450   :  { %2865 = vrcp.f32 %v1059_v2 }
 0x451   :  { %2867 = vrcp.f32 %v3319_v30 }
 0x453   :  { %v1062_v29 = vpop.xlane.xlu1 %1061 }
 0x454   :  { %2869 = vrcp.f32 %v1062_v29 }
 0x455   :  { %2871 = vrcp.f32 %v3332_v39 }
 0x456   :  { %v2862_v0 = vpop.eup %2861 }
 0x457   :  { %v2864_v34 = vpop.eup %2863  ;;  %v1065_v12 = vpop.xlane.xlu0 %1064  ;;  %v1078_v10 = vmul.f32 %v2862_v0, %v3365_v43 }
 0x458   :  { %2873 = vrcp.f32 %v1065_v12  ;;  %v1095_v30 = vsel %vm3323_vm8, 0.0, %v2864_v34  ;;  %v3457_v12 = vand.u32 4294901760, %v3200_v51 }
 0x459   :  { %v3417_v36 = vmul.f32 %v1094_v31, %v1078_v10 }
 0x45a   :  { %v2866_v19 = vpop.eup %2865 }
 0x45b   :  { %v2868_v38 = vpop.eup %2867  ;;  %v1118_v13 = vsel %vm993_vm7, %v3417_v36, 0.0  ;;  %v1079_v39 = vmul.f32 %v2866_v19, %v3369_v37 }
 0x45c   :  { %1119 = vadd.xlane.f32.xlu1 %v1118_v13  ;;  %v1096_v43 = vsel %vm3337_vm13, 0.0, %v2868_v38 }
 0x45d   :  { %v3424_v28 = vmul.f32 %v1095_v30, %v1079_v39 }
 0x45e   :  { %v2870_v14 = vpop.eup %2869 }
 0x45f   :  { %v2872_v44 = vpop.eup %2871  ;;  %v1121_v45 = vsel %vm993_vm7, %v3424_v28, 0.0  ;;  %v1080_v35 = vmul.f32 %v2870_v14, %v3373_v48 }
 0x460   :  { %1122 = vadd.xlane.f32.xlu0 %v1121_v45  ;;  %v1097_v37 = vsel %vm3346_vm3, 0.0, %v2872_v44 }
 0x461   :  { %v3431_v41 = vmul.f32 %v1096_v43, %v1080_v35 }
 0x462   :  { %v2874_v46 = vpop.eup %2873 }
 0x463   :  { %v1124_v58 = vsel %vm993_vm7, %v3431_v41, 0.0  ;;  %v1081_v59 = vmul.f32 %v2874_v46, %v3377_v57 }
 0x464   :  { %1125 = vadd.xlane.f32.xlu1 %v1124_v58 }
 0x465   :  { %v3438_v17 = vmul.f32 %v1097_v37, %v1081_v59 }
 0x467   :  { %v1127_v62 = vsel %vm993_vm7, %v3438_v17, 0.0 }
 0x468   :  { %1128 = vadd.xlane.f32.xlu0 %v1127_v62 }
 0x4c2   :  { %v1108_v48 = vpop.xlane.xlu1 %1107 }
 0x4c3   :  { %v1130_v63 = vmax.f32 %v1108_v48, 1e-12 }
 0x4c4   :  { %v1111_v1 = vpop.xlane.xlu0 %1110 }
 0x4c5   :  { %2875 = vrcp.f32 %v1130_v63  ;;  %v1131_v3 = vmax.f32 %v1111_v1, 1e-12 }
 0x4c6   :  { %v1114_v5 = vpop.xlane.xlu1 %1113 }
 0x4c7   :  { %2877 = vrcp.f32 %v1131_v3  ;;  %v1132_v54 = vmax.f32 %v1114_v5, 1e-12 }
 0x4c9   :  { %2879 = vrcp.f32 %v1132_v54 }
 0x4ca   :  { %v1117_v6 = vpop.xlane.xlu0 %1116 }
 0x4cb   :  { %v1133_v26 = vmax.f32 %v1117_v6, 1e-12 }
 0x4cd   :  { %2881 = vrcp.f32 %v1133_v26 }
 0x4cf   :  { %v2876_v57 = vpop.eup %2875 }
 0x4d0   :  { %v1146_v7 = vmul.f32 %v2876_v57, %v3389_v9 }
 0x4d1   :  { %v2878_v32 = vpop.eup %2877 }
 0x4d2   :  { %v1155_v8 = vsel %vm993_vm7, %v1146_v7, 0  ;;  %2411 = vst.msk [vmem:[#allocation11] sm:$0xff] %vm993_vm7, %v1146_v7  ;;  %v1147_v33 = vmul.f32 %v2878_v32, %v3395_v60 }
 0x4d3   :  { %v2880_v11 = vpop.eup %2879  ;;  %v1232_v15 = vand.u32 4294901760, %v1155_v8 }
 0x4d4   :  { %v1158_v42 = vsel %vm993_vm7, %v1147_v33, 0  ;;  %2412 = vst.msk [vmem:[#allocation11 + $0x8] sm:$0xff] %vm993_vm7, %v1147_v33  ;;  %v1148_v16 = vmul.f32 %v2880_v11, %v3399_v47 }
 0x4d5   :  { %v1233_v49 = vsub.f32 %v1155_v8, %v1232_v15  ;;  %v1242_v40 = vand.u32 4294901760, %v1158_v42 }
 0x4d6   :  { %v1161_v18 = vsel %vm993_vm7, %v1148_v16, 0  ;;  %2413 = vst.msk [vmem:[#allocation11 + $0x10] sm:$0xff] %vm993_vm7, %v1148_v16 }
 0x4d7   :  { %v2882_v9 = vpop.eup %2881  ;;  %v1234_v23 = vand.u32 4294901760, %v1233_v49  ;;  %v1243_v21 = vsub.f32 %v1158_v42, %v1242_v40  ;;  %v1252_v56 = vand.u32 4294901760, %v1161_v18 }
 0x4d8   :  { %v1149_v60 = vmul.f32 %v2882_v9, %v3406_v4 }
 0x4d9   :  { %v1235_v24 = vsub.f32 %v1233_v49, %v1234_v23  ;;  %2645 = vmatprep.mubr.f32.mxu1 %v1234_v23  ;;  %v1244_v22 = vand.u32 4294901760, %v1243_v21  ;;  %v1253_v25 = vsub.f32 %v1161_v18, %v1252_v56 }
 0x4da   :  { %v1164_v2 = vsel %vm993_vm7, %v1149_v60, 0  ;;  %2414 = vst.msk [vmem:[#allocation11 + $0x18] sm:$0xff] %vm993_vm7, %v1149_v60 }
 0x4db   :  { %v1245_v47 = vsub.f32 %v1243_v21, %v1244_v22  ;;  %2646 = vmatmul.mubr.f32.vlgmr.msra.gmra.mrb[0].mxu1 %v1244_v22  ;;  %v1236_v27 = vand.u32 4294901760, %v1235_v24  ;;  %v1254_v29 = vand.u32 4294901760, %v1253_v25  ;;  %v1262_v0 = vand.u32 4294901760, %v1164_v2 }
 0x4dc   :  { %2652 = vmatpush3.msra.mxu1 %v3211_v53  ;;  %v3463_v53 = vsub.f32 %v3200_v51, %v3457_v12 }
 0x4dd   :  { %v1246_v31 = vand.u32 4294901760, %v1245_v47  ;;  %2659 = vmatprep.subr.mxu1 %v3198_v50  ;;  %2621 = vmatprep.mubr.f32.mxu0 %v1236_v27  ;;  %v1255_v4 = vsub.f32 %v1253_v25, %v1254_v29  ;;  %v1263_v34 = vsub.f32 %v1164_v2, %v1262_v0 }
 0x4de   :  { %2648 = vmatprep.mubr.f32.mxu1 %v1254_v29  ;;  %v3466_v13 = vand.u32 4294901760, %v3463_v53 }
 0x4df   :  { %2622 = vmatmul.mubr.f32.vlgmr.msra.gmra.mrb[2].mxu0 %v1246_v31  ;;  %v1256_v10 = vand.u32 4294901760, %v1255_v4  ;;  %v1264_v19 = vand.u32 4294901760, %v1263_v34 }
 0x4e0   :  { %2628 = vmatpush3.msra.mxu0 %v3217_v55  ;;  %v1863_v51 = vsub.f32 %v3463_v53, %v3466_v13 }
 0x4e1   :  { %2635 = vmatprep.subr.mxu0 %v3203_v52  ;;  %2624 = vmatprep.mubr.f32.mxu0 %v1256_v10  ;;  %v1265_v30 = vsub.f32 %v1263_v34, %v1264_v19 }
 0x4e2   :  { %2649 = vmatmul.mubr.f32.gmra.mrb[2].mxu1 %v1264_v19 }
 0x4e3   :  { %2653 = vmatprep.mubr.f32.mxu1 %v1232_v15  ;;  %v1266_v38 = vand.u32 4294901760, %v1265_v30 }
 0x4e5   :  { %2625 = vmatmul.mubr.f32.gmra.mrb[4].mxu0 %v1266_v38 }
 0x4e6   :  { %2654 = vmatmul.mubr.f32.vlgmr.msra.gmra.mrb[0].mxu1 %v1242_v40  ;;  %2629 = vmatprep.mubr.f32.mxu0 %v1232_v15 }
 0x4e7   :  { %2660 = vmatpush3.msra.mxu1 %v3198_v50  ;;  %2656 = vmatprep.mubr.f32.mxu1 %v1252_v56  ;;  %v1864_v50 = vand.u32 4294901760, %v1863_v51 }
 0x4e8   :  { %2667 = vmatprep.subr.mxu1 %v3457_v12 }
 0x4e9   :  { %v1120_v55 = vpop.xlane.xlu1 %1119  ;;  %2630 = vmatmul.mubr.f32.vlgmr.msra.gmra.mrb[2].mxu0 %v1242_v40 }
 0x4ea   :  { %v1134_v39 = vmax.f32 %v1120_v55, 1e-12  ;;  %2636 = vmatpush3.msra.mxu0 %v3203_v52  ;;  %2657 = vmatmul.mubr.f32.gmra.mrb[2].mxu1 %v1262_v0 }
 0x4eb   :  { %2632 = vmatprep.mubr.f32.mxu0 %v1252_v56  ;;  %2661 = vmatprep.mubr.f32.mxu1 %v1232_v15 }
 0x4ec   :  { %2883 = vrcp.f32 %v1134_v39 }
 0x4ed   :  { %v1123_v14 = vpop.xlane.xlu0 %1122  ;;  %2633 = vmatmul.mubr.f32.gmra.mrb[4].mxu0 %v1262_v0 }
 0x4ee   :  { %v1135_v43 = vmax.f32 %v1123_v14, 1e-12  ;;  %2662 = vmatmul.mubr.f32.vlgmr.msra.gmra.mrb[0].mxu1 %v1242_v40  ;;  %2637 = vmatprep.mubr.f32.mxu0 %v1233_v49 }
 0x4ef   :  { %2668 = vmatpush3.msra.mxu1 %v3457_v12  ;;  %2664 = vmatprep.mubr.f32.mxu1 %v1252_v56 }
 0x4f0   :  { %2885 = vrcp.f32 %v1135_v43  ;;  %2675 = vmatprep.subr.mxu1 %v1864_v50 }
 0x4f1   :  { %v1126_v44 = vpop.xlane.xlu1 %1125  ;;  %2638 = vmatmul.mubr.f32.vlgmr.msra.gmra.mrb[2].mxu0 %v1243_v21 }
 0x4f2   :  { %v1136_v52 = vmax.f32 %v1126_v44, 1e-12  ;;  %2665 = vmatmul.mubr.f32.gmra.mrb[2].mxu1 %v1262_v0  ;;  %2640 = vmatprep.mubr.f32.mxu0 %v1253_v25 }
 0x4f4   :  { %2887 = vrcp.f32 %v1136_v52 }
 0x4f5   :  { %v1129_v45 = vpop.xlane.xlu0 %1128  ;;  %2641 = vmatmul.mubr.f32.gmra.mrb[4].mxu0 %v1263_v34 }
 0x4f6   :  { %v2884_v35 = vpop.eup %2883  ;;  %v1137_v46 = vmax.f32 %v1129_v45, 1e-12 }
 0x4f7   :  { %v1150_v37 = vmul.f32 %v2884_v35, %v3417_v36 }
 0x4f8   :  { %2889 = vrcp.f32 %v1137_v46 }
 0x4f9   :  { %v1742_v58 = vsel %vm993_vm7, %v1150_v37, 0  ;;  %2415 = vst.msk [vmem:[#allocation11 + $0x20] sm:$0xff] %vm993_vm7, %v1150_v37 }
 0x4fa   :  { %v2886_v59 = vpop.eup %2885  ;;  %v1819_v62 = vand.u32 4294901760, %v1742_v58 }
 0x4fb   :  { %v1151_v48 = vmul.f32 %v2886_v59, %v3424_v28 }
 0x4fc   :  { %v1820_v63 = vsub.f32 %v1742_v58, %v1819_v62 }
 0x4fd   :  { %v1745_v1 = vsel %vm993_vm7, %v1151_v48, 0  ;;  %2416 = vst.msk [vmem:[#allocation11 + $0x28] sm:$0xff] %vm993_vm7, %v1151_v48 }
 0x4fe   :  { %v2888_v3 = vpop.eup %2887  ;;  %v1829_v5 = vand.u32 4294901760, %v1745_v1  ;;  %v1821_v54 = vand.u32 4294901760, %v1820_v63 }
 0x4ff   :  { %v1152_v6 = vmul.f32 %v2888_v3, %v3431_v41 }
 0x500   :  { %v1830_v36 = vsub.f32 %v1745_v1, %v1829_v5  ;;  %v1822_v26 = vsub.f32 %v1820_v63, %v1821_v54 }
 0x501   :  { %2417 = vst.msk [vmem:[#allocation11 + $0x30] sm:$0xff] %vm993_vm7, %v1152_v6  ;;  %v1748_v57 = vsel %vm993_vm7, %v1152_v6, 0 }
 0x502   :  { %v2890_v7 = vpop.eup %2889  ;;  %v1823_v32 = vand.u32 4294901760, %v1822_v26  ;;  %v1831_v8 = vand.u32 4294901760, %v1830_v36  ;;  %v1839_v28 = vand.u32 4294901760, %v1748_v57 }
 0x503   :  { %v1153_v33 = vmul.f32 %v2890_v7, %v3438_v17 }
 0x504   :  { %2669 = vmatprep.mubr.f32.mxu1 %v1823_v32  ;;  %v1832_v11 = vsub.f32 %v1830_v36, %v1831_v8  ;;  %v1840_v15 = vsub.f32 %v1748_v57, %v1839_v28 }
 0x505   :  { %2418 = vst.msk [vmem:[#allocation11 + $0x38] sm:$0xff] %vm993_vm7, %v1153_v33  ;;  %v1751_v42 = vsel %vm993_vm7, %v1153_v33, 0 }
 0x506   :  { %v1833_v41 = vand.u32 4294901760, %v1832_v11  ;;  %v1841_v16 = vand.u32 4294901760, %v1840_v15  ;;  %v1849_v49 = vand.u32 4294901760, %v1751_v42 }
 0x508   :  { %2670 = vmatmul.mubr.f32.vlgmr.msra.gmra.mrb[4].mxu1 %v1833_v41  ;;  %v1842_v40 = vsub.f32 %v1840_v15, %v1841_v16  ;;  %v1850_v18 = vsub.f32 %v1751_v42, %v1849_v49 }
 0x509   :  { %2676 = vmatpush3.msra.mxu1 %v1864_v50 }
 0x50a   :  { %2683 = vmatprep.subr.mxu1 %v3463_v53  ;;  %v1843_v9 = vand.u32 4294901760, %v1842_v40  ;;  %v1851_v23 = vand.u32 4294901760, %v1850_v18 }
 0x50c   :  { %2672 = vmatprep.mubr.f32.mxu1 %v1843_v9  ;;  %v1852_v17 = vsub.f32 %v1850_v18, %v1851_v23 }
 0x50e   :  { %v1853_v21 = vand.u32 4294901760, %v1852_v17 }
 0x510   :  { %2673 = vmatmul.mubr.f32.gmra.mrb[6].mxu1 %v1853_v21 }
 0x511   :  { %2677 = vmatprep.mubr.f32.mxu1 %v1819_v62 }
 0x514   :  { %2678 = vmatmul.mubr.f32.vlgmr.msra.gmra.mrb[4].mxu1 %v1829_v5 }
 0x515   :  { %2684 = vmatpush3.msra.mxu1 %v3463_v53  ;;  %2680 = vmatprep.mubr.f32.mxu1 %v1839_v28 }
 0x516   :  { %2691 = vmatprep.subr.mxu1 %v3457_v12 }
 0x518   :  { %2681 = vmatmul.mubr.f32.gmra.mrb[6].mxu1 %v1849_v49 }
 0x519   :  { %2685 = vmatprep.mubr.f32.mxu1 %v1820_v63 }
 0x51c   :  { %2686 = vmatmul.mubr.f32.vlgmr.msra.gmra.mrb[4].mxu1 %v1830_v36 }
 0x51d   :  { %2692 = vmatpush3.msra.mxu1 %v3457_v12  ;;  %2688 = vmatprep.mubr.f32.mxu1 %v1840_v15 }
 0x51e   :  { %2699 = vmatprep.subr.mxu1 %v3466_v13 }
 0x520   :  { %2689 = vmatmul.mubr.f32.gmra.mrb[6].mxu1 %v1850_v18 }
 0x521   :  { %2693 = vmatprep.mubr.f32.mxu1 %v1821_v54 }
 0x524   :  { %2694 = vmatmul.mubr.f32.vlgmr.msra.gmra.mrb[4].mxu1 %v1831_v8 }
 0x525   :  { %2700 = vmatpush3.msra.mxu1 %v3466_v13  ;;  %2696 = vmatprep.mubr.f32.mxu1 %v1841_v16 }
 0x526   :  { %2707 = vmatprep.subr.mxu1 %v3457_v12 }
 0x528   :  { %2697 = vmatmul.mubr.f32.gmra.mrb[6].mxu1 %v1851_v23 }
 0x529   :  { %2701 = vmatprep.mubr.f32.mxu1 %v1819_v62 }
 0x52c   :  { %2702 = vmatmul.mubr.f32.vlgmr.msra.gmra.mrb[4].mxu1 %v1829_v5 }
 0x52d   :  { %2708 = vmatpush3.msra.mxu1 %v3457_v12  ;;  %2704 = vmatprep.mubr.f32.mxu1 %v1839_v28 }
 0x530   :  { %2705 = vmatmul.mubr.f32.gmra.mrb[6].mxu1 %v1849_v49 }
 0x531   :  { %2709 = vmatprep.mubr.f32.mxu1 %v1819_v62 }
 0x534   :  { %2710 = vmatmul.mubr.f32.vlgmr.msra.gmra.mrb[4].mxu1 %v1829_v5 }
 0x535   :  { %2712 = vmatprep.mubr.f32.mxu1 %v1839_v28 }
 0x538   :  { %2713 = vmatmul.mubr.f32.gmra.mrb[6].mxu1 %v1849_v49 }
 0x539   :  { %2992 = shalt.err (!%p2989_p8)
}
 0x53a   :  { %s2993_s19 = scalar_lea.hbm %s3554_s8, 1024 }
 0x53b   :  { %p2994_p9 = scmp.ne.s32.totalorder %s3554_s8, %s2993_s19  ;;  %p2997_p10 = scmp.lt.u32.totalorder %s2993_s19, %s3554_s8 }
 0x53d   :  { %p2999_p11 = pnand %p2997_p10, %p2994_p9 }
 0x53f   :  { %3002 = shalt.err (!%p2999_p11)
}
 0x540   :  { %2442 = dma.vmem_to_hbm [thread:$0]  %s2437_s13, 1024, %s3554_s8, [#allocation12], %s3037_s17, %s3037_s17, %s3038_s18   ;;  %v2891_v58 = vld [vmem:[#allocation2] sm:$0xff]  ;;  %v2892_v15 = vld [vmem:[#allocation2 + $0x8] sm:$0xff] }
 0x541   :  { %v2455_v56 = vld.sshfl [vmem:[%s3551_s5] sm:$0x33 pattern:$0x75316420] }
 0x542   :  { %v2337_v60 = vcombine.high %v2455_v56, %v2455_v56  ;;  %v2344_v22 = vrot.slane %v2455_v56, %v3232_v20 }
 0x544   :  { %v2351_v24 = vrot.slane %v2337_v60, %v3232_v20  ;;  %v2357_v29 = vrot.slane %v2344_v22, %v3220_v61  ;;  %v2352_v31 = vcombine.high %v2344_v22, %v2344_v22 }
 0x546   :  { %v2361_v47 = vrot.slane %v2351_v24, %v3220_v61  ;;  %v2353_v0 = vcombine.high %v2351_v24, %v2351_v24  ;;  %v2365_v20 = vrot.slane %v2352_v31, %v3220_v61 }
 0x548   :  { %v2369_v13 = vrot.slane %v2353_v0, %v3220_v61  ;;  %v2456_v61 = vld [vmem:[%s3552_s6] ss:$0 sm:$0xff]  ;;  %s3045_s6 = smov [#allocation10]  }
 0x549   :  { %s2424_s26 = sshll.u32 %s3045_s6, 4  ;;  %s2425_s26 = int_to_ptr.vmem [resolvable:$true] %s2424_s26 }
 0x54a   :  { %s3003_s27 = scalar_lea.vmem %s2425_s26, 256  ;;  %p3008_p13 = scmp.lt.s32.totalorder %s2425_s26, %s2425_s26 }
 0x54b   :  { %p3004_p12 = scmp.ne.s32.totalorder %s2425_s26, %s3003_s27  ;;  %p3009_p0 = scmp.lt.s32.totalorder %s3003_s27, %s3003_s27 }
 0x54d   :  { %p3010_p1 = por %p3009_p0, %p3008_p13 }
 0x54f   :  { %p3011_p2 = pnand %p3010_p1, %p3004_p12 }
 0x5c1   :  { %v2663_v25 = vpop.f32.mrb[0].mxu1 }
 0x5c2   :  { %v1719_v2 = vpop.f32.mrb[1].mxu1 }
 0x5c4   :  { %v2639_v27 = vpop.f32.mrb[2].mxu0 }
 0x5c5   :  { %v2765_v4 = vadd.f32 %v2663_v25, %v2639_v27  ;;  %v2666_v34 = vpop.f32.mrb[2].mxu1  ;;  %v1436_v12 = vpop.f32.mrb[3].mxu0 }
 0x5c6   :  { %v2766_v10 = vadd.f32 %v1719_v2, %v1436_v12  ;;  %v1731_v19 = vpop.f32.mrb[3].mxu1 }
 0x5c7   :  { %v2375_v30 = vmul.f32 %v2765_v4, %v2361_v47 }
 0x5c8   :  { %v2374_v53 = vmul.f32 %v2766_v10, %v2357_v29  ;;  %v2642_v38 = vpop.f32.mrb[4].mxu0 }
 0x5c9   :  { %v2383_v55 = vsel %vm98_vm0, %v2375_v30, 0.0  ;;  %v2767_v39 = vadd.f32 %v2666_v34, %v2642_v38  ;;  %v1450_v51 = vpop.f32.mrb[5].mxu0 }
 0x5ca   :  { %v2382_v14 = vsel %vm98_vm0, %v2374_v53, 0.0  ;;  %v2768_v43 = vadd.f32 %v1731_v19, %v1450_v51 }
 0x5cb   :  { %v2384_v50 = vadd.f32 %v2383_v55, %v2382_v14  ;;  %v2377_v44 = vmul.f32 %v2767_v39, %v2369_v13 }
 0x5cc   :  { %v2376_v52 = vmul.f32 %v2768_v43, %v2365_v20 }
 0x5cd   :  { %v2387_v46 = vsel %vm98_vm0, %v2377_v44, 0.0 }
 0x5ce   :  { %v2385_v45 = vsel %vm98_vm0, %v2376_v52, 0.0 }
 0x5cf   :  { %v2386_v35 = vadd.f32 %v2385_v45, %v2384_v50 }
 0x5d1   :  { %v2388_v37 = vadd.f32 %v2387_v46, %v2386_v35 }
 0x5d3   :  { %v2396_v59 = vadd.f32 %v2891_v58, %v2388_v37 }
 0x5d5   :  { %v2405_v62 = vadd.f32 %v2456_v61, %v2396_v59 }
 0x5d7   :  { %v2407_v48 = vmax.f32 %v2405_v62, 0.0 }
 0x5d9   :  { %2409 = vst.msk [vmem:[#allocation10] sm:$0xff] %vm98_vm0, %v2407_v48 }
 0x607   :  { %v2711_v63 = vpop.f32.mrb[4].mxu1 }
 0x608   :  { %v2379_v1 = vmul.f32 %v2711_v63, %v2361_v47  ;;  %v2306_v3 = vpop.f32.mrb[5].mxu1 }
 0x609   :  { %v2378_v5 = vmul.f32 %v2357_v29, %v2306_v3 }
 0x60a   :  { %v2390_v54 = vsel %vm98_vm0, %v2379_v1, 0.0 }
 0x60b   :  { %v2389_v6 = vsel %vm98_vm0, %v2378_v5, 0.0  ;;  %v2714_v36 = vpop.f32.mrb[6].mxu1 }
 0x60c   :  { %v2391_v26 = vadd.f32 %v2390_v54, %v2389_v6  ;;  %v2318_v57 = vpop.f32.mrb[7].mxu1  ;;  %v2381_v7 = vmul.f32 %v2714_v36, %v2369_v13 }
 0x60d   :  { %v2380_v32 = vmul.f32 %v2365_v20, %v2318_v57 }
 0x60e   :  { %v2394_v33 = vsel %vm98_vm0, %v2381_v7, 0.0 }
 0x60f   :  { %v2392_v8 = vsel %vm98_vm0, %v2380_v32, 0.0 }
 0x610   :  { %v2393_v28 = vadd.f32 %v2392_v8, %v2391_v26 }
 0x612   :  { %v2395_v11 = vadd.f32 %v2394_v33, %v2393_v28 }
 0x614   :  { %v2397_v42 = vadd.f32 %v2892_v15, %v2395_v11 }
 0x616   :  { %v2406_v41 = vadd.f32 %v2456_v61, %v2397_v42 }
 0x618   :  { %v2408_v16 = vmax.f32 %v2406_v41, 0.0 }
 0x61a   :  { %2410 = vst.msk [vmem:[#allocation10 + $0x8] sm:$0xff] %vm98_vm0, %v2408_v16 }
 0x61b   :  { %3014 = shalt.err (!%p3011_p2)
}
 0x61c   :  { %s3015_s28 = scalar_lea.hbm %s3553_s7, 256 }
 0x61d   :  { %p3016_p3 = scmp.ne.s32.totalorder %s3553_s7, %s3015_s28  ;;  %p3019_p4 = scmp.lt.u32.totalorder %s3015_s28, %s3553_s7 }
 0x61f   :  { %p3021_p5 = pnand %p3019_p4, %p3016_p3 }
 0x621   :  { %3024 = shalt.err (!%p3021_p5)
}
 0x622   :  { %2430 = dma.vmem_to_hbm [thread:$0]  %s2425_s26, 256, %s3553_s7, [#allocation4], %s3037_s17, %s3037_s17, %s3038_s18  }
 0x623   :  { %3031 = dma.done.wait [#allocation4], 256  }
 0x624   :  { %3032 = vsyncadd [#allocation4], 4294967040 }
 0x625   :  { %3033 = dma.done.wait [#allocation12], 1024  }
 0x626   :  { %3034 = vsyncadd [#allocation12], 4294966272 }
 0x627   :  { %2449 = vsyncpa [#allocation3], 1 }
 0x628   :  { %2450 = vsyncpa [#allocation6], 1 }
 0x629   :  { %2451 = vsyncpa [#allocation9], 1 }
 0x62a   :  { %2452 = vsyncpa [#allocation4], 1 }
 0x62b   :  { %2453 = vsyncpa [#allocation12], 1 }

</bundles_post_ra>
